<compile_context>
chip_gen: v7x
topology: tpu7x:2x2x1
jax: 0.10.0
libtpu: 0.0.40
codegen_flags: <defaults>
</compile_context>

<pallas_src>
import functools
import math

import jax
import jax.numpy as jnp
from jax.experimental import pallas as pl
from jax.experimental.pallas import tpu as pltpu


def _round_up(n, m):
    return ((n + m - 1) // m) * m


def _ffn_kernel(x_ref, w1_ref, b1_ref, w2_ref, b2_ref, o_ref, *, compute_dtype):
    # x_ref:  (TM, dim)      token tile
    # w1_ref: (dim, hidden)  first linear weight  (already in compute_dtype)
    # b1_ref: (1, hidden)    f32
    # w2_ref: (hidden, dim)  second linear weight (already in compute_dtype)
    # b2_ref: (1, dim)       f32
    x = x_ref[...].astype(compute_dtype)

    # Linear 1 (MXU, f32 accumulation)
    h = jnp.dot(x, w1_ref[...], preferred_element_type=jnp.float32)
    h = h + b1_ref[...]

    # Exact (erf-based) GELU in f32 -- matches torch.nn.GELU() default.
    h = 0.5 * h * (1.0 + jax.lax.erf(h * (1.0 / math.sqrt(2.0))))

    # Dropout(p=0.0) is the identity -> no masking.

    # Linear 2 (MXU, f32 accumulation)
    y = jnp.dot(h.astype(compute_dtype), w2_ref[...],
                preferred_element_type=jnp.float32)
    y = y + b2_ref[...]

    o_ref[...] = y.astype(o_ref.dtype)


def feed_forward(x, w1, b1, w2, b2, *, row_tile=512, compute_dtype=None):
    """x: (batch, seq, dim). Returns (batch, seq, dim).

    row_tile:       max token-rows per grid step (will be shrunk for tiny inputs,
                    always a multiple of 8).
    compute_dtype:  dtype fed to the MXU (e.g. jnp.bfloat16); accumulation stays f32.
                    Defaults to x.dtype (exact f32 path).
    """
    batch, seq, dim = x.shape
    hidden = w1.shape[1]
    tokens = batch * seq
    if compute_dtype is None:
        compute_dtype = x.dtype
    compute_dtype = jnp.dtype(compute_dtype)

    # Effective token tile: <= row_tile, multiple of 8, no bigger than needed.
    tm = min(row_tile, _round_up(tokens, 8))
    tm = _round_up(tm, 8)
    tokens_padded = _round_up(tokens, tm)

    x2d = x.reshape(tokens, dim)
    if tokens_padded != tokens:
        x2d = jnp.pad(x2d, ((0, tokens_padded - tokens), (0, 0)))

    # Cast weights once (halves HBM traffic / VMEM residency if bf16); biases f32.
    w1c = w1.astype(compute_dtype)
    w2c = w2.astype(compute_dtype)
    b1_2d = b1.reshape(1, hidden).astype(jnp.float32)
    b2_2d = b2.reshape(1, dim).astype(jnp.float32)

    grid = (tokens_padded // tm,)

    # --- VMEM budget: 2x double-buffered inputs/outputs + intermediate, with headroom.
    w_itemsize = compute_dtype.itemsize
    io_itemsize = jnp.dtype(x.dtype).itemsize
    x_tile_bytes = tm * dim * io_itemsize
    o_tile_bytes = tm * dim * io_itemsize
    w_bytes = (dim * hidden + hidden * dim) * w_itemsize
    b_bytes = (hidden + dim) * 4
    h_bytes = tm * hidden * 4  # f32 intermediate inside the kernel
    needed = 2 * (x_tile_bytes + o_tile_bytes + w_bytes + b_bytes) + 2 * h_bytes
    vmem_limit = int(min(100 * 1024 * 1024, int(needed * 1.5) + (8 << 20)))

    cost = pl.CostEstimate(
        flops=2 * tokens_padded * dim * hidden * 2,
        transcendentals=tokens_padded * hidden,
        bytes_accessed=(tokens_padded * dim * io_itemsize          # x
                        + (dim * hidden + hidden * dim) * w_itemsize  # weights
                        + (hidden + dim) * 4                          # biases
                        + tokens_padded * dim * io_itemsize),         # out
    )

    out2d = pl.pallas_call(
        functools.partial(_ffn_kernel, compute_dtype=compute_dtype),
        out_shape=jax.ShapeDtypeStruct((tokens_padded, dim), x.dtype),
        grid_spec=pltpu.PrefetchScalarGridSpec(
            num_scalar_prefetch=0,
            grid=grid,
            in_specs=[
                pl.BlockSpec((tm, dim), lambda i: (i, 0)),       # x tile
                pl.BlockSpec((dim, hidden), lambda i: (0, 0)),   # w1 (whole, resident)
                pl.BlockSpec((1, hidden), lambda i: (0, 0)),     # b1
                pl.BlockSpec((hidden, dim), lambda i: (0, 0)),   # w2 (whole, resident)
                pl.BlockSpec((1, dim), lambda i: (0, 0)),        # b2
            ],
            out_specs=pl.BlockSpec((tm, dim), lambda i: (i, 0)),
        ),
        compiler_params=pltpu.CompilerParams(
            dimension_semantics=("parallel",),
            vmem_limit_bytes=vmem_limit,
        ),
        cost_estimate=cost,
    )(x2d, w1c, b1_2d, w2c, b2_2d)

    if tokens_padded != tokens:
        out2d = out2d[:tokens]
    return out2d.reshape(batch, seq, dim)


def init_params(key, dim, hidden_dim, dtype=jnp.float32):
    """Mimics nn.Linear's uniform(-1/sqrt(fan_in), 1/sqrt(fan_in)) init.

    Weights stored as (in, out), i.e. transposed from PyTorch's (out, in).
    """
    k1, k2, k3, k4 = jax.random.split(key, 4)
    bound1 = 1.0 / math.sqrt(dim)
    bound2 = 1.0 / math.sqrt(hidden_dim)
    w1 = jax.random.uniform(k1, (dim, hidden_dim), dtype, -bound1, bound1)
    b1 = jax.random.uniform(k2, (hidden_dim,), dtype, -bound1, bound1)
    w2 = jax.random.uniform(k3, (hidden_dim, dim), dtype, -bound2, bound2)
    b2 = jax.random.uniform(k4, (dim,), dtype, -bound2, bound2)
    return w1, b1, w2, b2


def _reference(x, w1, b1, w2, b2):
    h = x @ w1 + b1
    h = 0.5 * h * (1.0 + jax.lax.erf(h / math.sqrt(2.0)))
    return h @ w2 + b2


if __name__ == "__main__":
    key = jax.random.PRNGKey(0)
    kx, kp, kx2 = jax.random.split(key, 3)

    # --- Small base case (same shapes as the module implies) ---
    batch, seq, dim, hidden_dim = 2, 8, 128, 256
    x = jax.random.normal(kx, (batch, seq, dim), dtype=jnp.float32)
    w1, b1, w2, b2 = init_params(kp, dim, hidden_dim)

    out = jax.block_until_ready(feed_forward(x, w1, b1, w2, b2))
    ref = _reference(x, w1, b1, w2, b2)
    assert out.shape == (batch, seq, dim)
    assert jnp.allclose(out, ref, atol=1e-5, rtol=1e-5)

    # --- Ragged token count (ViT-style seq=197) exercises padding + large tile ---
    x2 = jax.random.normal(kx2, (2, 197, dim), dtype=jnp.float32)
    out2 = jax.block_until_ready(feed_forward(x2, w1, b1, w2, b2, row_tile=512))
    ref2 = _reference(x2, w1, b1, w2, b2)
    assert out2.shape == x2.shape
    assert jnp.allclose(out2, ref2, atol=1e-5, rtol=1e-5)

    # --- bf16-matmul fast path (f32 accumulation), loosened tolerance ---
    out3 = jax.block_until_ready(
        feed_forward(x2, w1, b1, w2, b2, row_tile=512, compute_dtype=jnp.bfloat16))
    assert jnp.allclose(out3, ref2, atol=5e-2, rtol=5e-2)

    print("KERNEL_OK")
</pallas_src>

<mosaic_0001>
module attributes {stable_mosaic.version = 11 : i64} {
  func.func @_ffn_kernel(%arg0: i32, %arg1: memref<16x128xf32, #tpu.memory_space<vmem>>, %arg2: memref<128x256xf32, #tpu.memory_space<vmem>>, %arg3: memref<1x256xf32, #tpu.memory_space<vmem>>, %arg4: memref<256x128xf32, #tpu.memory_space<vmem>>, %arg5: memref<1x128xf32, #tpu.memory_space<vmem>>, %arg6: memref<16x128xf32, #tpu.memory_space<vmem>>) attributes {dimension_semantics = [#tpu.dimension_semantics<parallel>], iteration_bounds = array<i64: 1>, scalar_prefetch = 0 : i64, scratch_operands = 0 : i64, tpu.core_type = #tpu.core_type<tc>, window_params = [{transform_indices = @transform_0, window_bounds = array<i64: 16, 128>}, {pipeline_mode = #tpu.pipeline_mode<synchronous>, transform_indices = @transform_1, window_bounds = array<i64: 128, 256>}, {pipeline_mode = #tpu.pipeline_mode<synchronous>, transform_indices = @transform_2, window_bounds = array<i64: 1, 256>}, {pipeline_mode = #tpu.pipeline_mode<synchronous>, transform_indices = @transform_3, window_bounds = array<i64: 256, 128>}, {pipeline_mode = #tpu.pipeline_mode<synchronous>, transform_indices = @transform_4, window_bounds = array<i64: 1, 128>}, {transform_indices = @transform_5, window_bounds = array<i64: 16, 128>}]} {
    %c0 = arith.constant 0 : index
    %c0_0 = arith.constant 0 : index
    %0 = vector.load %arg1[%c0, %c0_0] : memref<16x128xf32, #tpu.memory_space<vmem>>, vector<16x128xf32>
    %c0_1 = arith.constant 0 : index
    %c0_2 = arith.constant 0 : index
    %1 = vector.load %arg2[%c0_1, %c0_2] : memref<128x256xf32, #tpu.memory_space<vmem>>, vector<128x256xf32>
    %cst = arith.constant dense<0.000000e+00> : vector<16x256xf32>
    %2 = tpu.matmul %0, %1, %cst {dimension_numbers = #tpu.dot_dimension_numbers<[1], [0], [0], [1], [0, 0, 1, 1], [], []>} : vector<16x128xf32>, vector<128x256xf32>, vector<16x256xf32> -> vector<16x256xf32>
    %c0_3 = arith.constant 0 : index
    %c0_4 = arith.constant 0 : index
    %3 = vector.load %arg3[%c0_3, %c0_4] : memref<1x256xf32, #tpu.memory_space<vmem>>, vector<1x256xf32>
    %4 = vector.broadcast %3 : vector<1x256xf32> to vector<16x256xf32>
    %5 = arith.addf %2, %4 : vector<16x256xf32>
    %cst_5 = arith.constant 5.000000e-01 : f32
    %6 = vector.broadcast %cst_5 : f32 to vector<16x256xf32>
    %7 = arith.mulf %6, %5 : vector<16x256xf32>
    %cst_6 = arith.constant 0.707106769 : f32
    %8 = vector.broadcast %cst_6 : f32 to vector<16x256xf32>
    %9 = arith.mulf %5, %8 : vector<16x256xf32>
    %10 = math.erf %9 : vector<16x256xf32>
    %cst_7 = arith.constant 1.000000e+00 : f32
    %11 = vector.broadcast %cst_7 : f32 to vector<16x256xf32>
    %12 = arith.addf %11, %10 : vector<16x256xf32>
    %13 = arith.mulf %7, %12 : vector<16x256xf32>
    %c0_8 = arith.constant 0 : index
    %c0_9 = arith.constant 0 : index
    %14 = vector.load %arg4[%c0_8, %c0_9] : memref<256x128xf32, #tpu.memory_space<vmem>>, vector<256x128xf32>
    %cst_10 = arith.constant dense<0.000000e+00> : vector<16x128xf32>
    %15 = tpu.matmul %13, %14, %cst_10 {dimension_numbers = #tpu.dot_dimension_numbers<[1], [0], [0], [1], [0, 0, 1, 1], [], []>} : vector<16x256xf32>, vector<256x128xf32>, vector<16x128xf32> -> vector<16x128xf32>
    %c0_11 = arith.constant 0 : index
    %c0_12 = arith.constant 0 : index
    %16 = vector.load %arg5[%c0_11, %c0_12] : memref<1x128xf32, #tpu.memory_space<vmem>>, vector<1x128xf32>
    %17 = vector.broadcast %16 : vector<1x128xf32> to vector<16x128xf32>
    %18 = arith.addf %15, %17 : vector<16x128xf32>
    %c0_13 = arith.constant 0 : index
    %c0_14 = arith.constant 0 : index
    %19 = vector.load %arg6[%c0_13, %c0_14] : memref<16x128xf32, #tpu.memory_space<vmem>>, vector<16x128xf32>
    tpu.vector_store %arg6[%c0_13, %c0_14], %18 {strides = array<i32>} : memref<16x128xf32, #tpu.memory_space<vmem>>, vector<16x128xf32>,
    return
  }
  func.func @transform_0(%arg0: i32) -> (i32, i32) {
    %c0_i32 = arith.constant 0 : i32
    %c0_i32_0 = arith.constant 0 : i32
    return %arg0, %c0_i32 : i32, i32
  }
  func.func @transform_1(%arg0: i32) -> (i32, i32) {
    %c0_i32 = arith.constant 0 : i32
    %c0_i32_0 = arith.constant 0 : i32
    %c0_i32_1 = arith.constant 0 : i32
    return %c0_i32, %c0_i32_0 : i32, i32
  }
  func.func @transform_2(%arg0: i32) -> (i32, i32) {
    %c0_i32 = arith.constant 0 : i32
    %c0_i32_0 = arith.constant 0 : i32
    %c0_i32_1 = arith.constant 0 : i32
    return %c0_i32, %c0_i32_0 : i32, i32
  }
  func.func @transform_3(%arg0: i32) -> (i32, i32) {
    %c0_i32 = arith.constant 0 : i32
    %c0_i32_0 = arith.constant 0 : i32
    %c0_i32_1 = arith.constant 0 : i32
    return %c0_i32, %c0_i32_0 : i32, i32
  }
  func.func @transform_4(%arg0: i32) -> (i32, i32) {
    %c0_i32 = arith.constant 0 : i32
    %c0_i32_0 = arith.constant 0 : i32
    %c0_i32_1 = arith.constant 0 : i32
    return %c0_i32, %c0_i32_0 : i32, i32
  }
  func.func @transform_5(%arg0: i32) -> (i32, i32) {
    %c0_i32 = arith.constant 0 : i32
    %c0_i32_0 = arith.constant 0 : i32
    return %arg0, %c0_i32 : i32, i32
  }
}

</mosaic_0001>

<bundles_post_ra>
// kernel: tpu_custom_call.1
= control target key start
LH: loop header
LB: loop body
LE: loop exit
PB: predicated region body
PF: predicated region fallthrough
CT: control target
= control target key end

     0   :  { %10 = vsyncpa [#allocation3], 0  ;;  %s657_s0 = inlined_call_operand.hbm [shape: f32[16,128], index: 0, kind: input, shape index: {}]   ;;  %s658_s1 = inlined_call_operand.hbm [shape: f32[128,256], index: 1, kind: input, shape index: {}]   ;;  %s659_s2 = inlined_call_operand.vmem [shape: f32[1,256], index: 2, kind: input, shape index: {}]   ;;  %s660_s3 = inlined_call_operand.hbm [shape: f32[256,128], index: 3, kind: input, shape index: {}]   ;;  %s661_s4 = inlined_call_operand.vmem [shape: f32[1,128], index: 4, kind: input, shape index: {}]   ;;  %s662_s5 = inlined_call_operand.hbm [shape: f32[16,128], index: 5, kind: output, shape index: {}]  }
   0x1   :  { %11 = vsyncpa [#allocation6], 0 }
   0x2   :  { %12 = vsyncpa [#allocation4], 0  ;;  %s553_s18 = smov [#allocation5]   ;;  %s459_s22 = scalar_lea.hbm %s658_s1, 4096 }
   0x3   :  { %s30_s19 = sshll.u32 %s553_s18, 4  ;;  %p460_p0 = scmp.ne.s32.totalorder %s658_s1, %s459_s22  ;;  %s31_s19 = int_to_ptr.vmem [resolvable:$true] %s30_s19 }
   0x4   :  { %p463_p1 = scmp.lt.u32.totalorder %s459_s22, %s658_s1 }
   0x6   :  { %p465_p2 = pnand %p463_p1, %p460_p0 }
   0x8   :  { %468 = shalt.err (!%p465_p2)
}
   0x9   :  { %s469_s27 = scalar_lea.vmem %s31_s19, 4096  ;;  %p474_p4 = scmp.lt.s32.totalorder %s31_s19, %s31_s19 }
   0xa   :  { %p470_p3 = scmp.ne.s32.totalorder %s31_s19, %s469_s27  ;;  %p475_p5 = scmp.lt.s32.totalorder %s469_s27, %s469_s27 }
   0xc   :  { %p476_p6 = por %p475_p5, %p474_p4 }
   0xe   :  { %p477_p7 = pnand %p476_p6, %p470_p3 }
  0x10   :  { %480 = shalt.err (!%p477_p7)
}
  0x11   :  { %s554_s28 = smov 256   ;;  %s555_s29 = smov 16  }
  0x12   :  { %36 = dma.hbm_to_vmem [thread:$0]  %s658_s1, 4096, %s31_s19, [#allocation6], %s554_s28, %s554_s28, %s555_s29  }
  0x13   :  { %s556_s7 = smov [#allocation2]   ;;  %s481_s11 = scalar_lea.hbm %s657_s0, 256 }
  0x14   :  { %s18_s8 = sshll.u32 %s556_s7, 4  ;;  %p482_p8 = scmp.ne.s32.totalorder %s657_s0, %s481_s11  ;;  %s19_s8 = int_to_ptr.vmem [resolvable:$true] %s18_s8 }
  0x15   :  { %p485_p9 = scmp.lt.u32.totalorder %s481_s11, %s657_s0 }
  0x17   :  { %p487_p10 = pnand %p485_p9, %p482_p8 }
  0x19   :  { %490 = shalt.err (!%p487_p10)
}
  0x1a   :  { %s491_s16 = scalar_lea.vmem %s19_s8, 256  ;;  %p496_p12 = scmp.lt.s32.totalorder %s19_s8, %s19_s8 }
  0x1b   :  { %p492_p11 = scmp.ne.s32.totalorder %s19_s8, %s491_s16  ;;  %p497_p13 = scmp.lt.s32.totalorder %s491_s16, %s491_s16 }
  0x1d   :  { %p498_p0 = por %p497_p13, %p496_p12 }
  0x1f   :  { %p499_p1 = pnand %p498_p0, %p492_p11 }
  0x21   :  { %502 = shalt.err (!%p499_p1)
}
  0x22   :  { %s557_s1 = smov 128   ;;  %s558_s17 = smov 8  }
  0x23   :  { %24 = dma.hbm_to_vmem [thread:$0]  %s657_s0, 256, %s19_s8, [#allocation3], %s557_s1, %s557_s1, %s558_s17  }
  0x24   :  { %s559_s20 = smov [#allocation7]   ;;  %s503_s24 = scalar_lea.hbm %s660_s3, 4096 }
  0x25   :  { %s44_s21 = sshll.u32 %s559_s20, 4  ;;  %p504_p2 = scmp.ne.s32.totalorder %s660_s3, %s503_s24  ;;  %s45_s21 = int_to_ptr.vmem [resolvable:$true] %s44_s21 }
  0x26   :  { %p507_p3 = scmp.lt.u32.totalorder %s503_s24, %s660_s3 }
  0x28   :  { %p509_p4 = pnand %p507_p3, %p504_p2 }
  0x2a   :  { %512 = shalt.err (!%p509_p4)
}
  0x2b   :  { %s513_s29 = scalar_lea.vmem %s45_s21, 4096  ;;  %p518_p6 = scmp.lt.s32.totalorder %s45_s21, %s45_s21 }
  0x2c   :  { %p514_p5 = scmp.ne.s32.totalorder %s45_s21, %s513_s29  ;;  %p519_p7 = scmp.lt.s32.totalorder %s513_s29, %s513_s29 }
  0x2e   :  { %p520_p8 = por %p519_p7, %p518_p6 }
  0x30   :  { %p521_p9 = pnand %p520_p8, %p514_p5 }
  0x32   :  { %524 = shalt.err (!%p521_p9)
}
  0x33   :  { %50 = dma.hbm_to_vmem [thread:$0]  %s660_s3, 4096, %s45_s21, [#allocation6], %s557_s1, %s557_s1, %s558_s17  }
  0x34   :  { %547 = dma.done.wait [#allocation3], 256  }
  0x35   :  { %548 = vsyncadd [#allocation3], 4294967040 }
  0x36   :  { %549 = dma.done.wait [#allocation6], 8192  }
  0x37   :  { %550 = vsyncadd [#allocation6], 4294959104  ;;  %v560_v0 = vmov 0.0   ;;  %v65_v1 = vld [vmem:[#allocation5 + $0x8] sm:$0xff]  ;;  %v67_v2 = vld [vmem:[#allocation5 + $0x18] sm:$0xff]  ;;  %s561_s8 = smov [#allocation8]  }
  0x38   :  { %172 = vmatprep.mubr.f32.mxu0 %v560_v0  ;;  %v64_v3 = vld [vmem:[#allocation5] sm:$0xff]  ;;  %v378_v4 = vpack.c.bf16 %v67_v2, %v65_v1  ;;  %v66_v5 = vld [vmem:[#allocation5 + $0x10] sm:$0xff]  ;;  %v69_v6 = vld [vmem:[#allocation5 + $0x28] sm:$0xff]  ;;  %s326_s9 = sshll.u32 %s561_s8, 4  ;;  %s327_s9 = int_to_ptr.vmem [resolvable:$true] %s326_s9 }
  0x39   :  { %v71_v7 = vld [vmem:[#allocation5 + $0x38] sm:$0xff]  ;;  %v380_v8 = vpack.c.bf16 %v66_v5, %v64_v3  ;;  %v68_v10 = vld [vmem:[#allocation5 + $0x20] sm:$0xff]  ;;  %v70_v11 = vld [vmem:[#allocation5 + $0x30] sm:$0xff]  ;;  %s525_s10 = scalar_lea.vmem %s327_s9, 256  ;;  %p530_p11 = scmp.lt.s32.totalorder %s327_s9, %s327_s9 }
  0x3a   :  { %v382_v9 = vpack.c.bf16 %v71_v7, %v69_v6  ;;  %v73_v12 = vld [vmem:[#allocation5 + $0x48] sm:$0xff]  ;;  %379 = vmatprep.subr.bf16.mxu0 %v378_v4  ;;  %v75_v13 = vld [vmem:[#allocation5 + $0x58] sm:$0xff]  ;;  %v384_v14 = vpack.c.bf16 %v70_v11, %v68_v10  ;;  %v72_v16 = vld [vmem:[#allocation5 + $0x40] sm:$0xff]  ;;  %p526_p10 = scmp.ne.s32.totalorder %s327_s9, %s525_s10  ;;  %p531_p12 = scmp.lt.s32.totalorder %s525_s10, %s525_s10 }
  0x3b   :  { %381 = vmatpush1.bf16.msra.mxu0 %v380_v8  ;;  %v386_v15 = vpack.c.bf16 %v75_v13, %v73_v12  ;;  %v74_v17 = vld [vmem:[#allocation5 + $0x50] sm:$0xff]  ;;  %v77_v18 = vld [vmem:[#allocation5 + $0x68] sm:$0xff]  ;;  %v79_v19 = vld [vmem:[#allocation5 + $0x78] sm:$0xff] }
  0x3c   :  { %383 = vmatprep.subr.bf16.mxu0 %v382_v9  ;;  %v388_v20 = vpack.c.bf16 %v74_v17, %v72_v16  ;;  %v390_v21 = vpack.c.bf16 %v79_v19, %v77_v18  ;;  %v76_v22 = vld [vmem:[#allocation5 + $0x60] sm:$0xff]  ;;  %v78_v23 = vld [vmem:[#allocation5 + $0x70] sm:$0xff]  ;;  %v81_v24 = vld [vmem:[#allocation5 + $0x88] sm:$0xff]  ;;  %p532_p13 = por %p531_p12, %p530_p11 }
  0x3d   :  { %v83_v25 = vld [vmem:[#allocation5 + $0x98] sm:$0xff]  ;;  %v80_v26 = vld [vmem:[#allocation5 + $0x80] sm:$0xff]  ;;  %v82_v27 = vld [vmem:[#allocation5 + $0x90] sm:$0xff]  ;;  %v392_v30 = vpack.c.bf16 %v78_v23, %v76_v22 }
  0x3e   :  { %v221_v28 = vld [vmem:[#allocation7 + $0x80] sm:$0xff]  ;;  %v222_v29 = vld [vmem:[#allocation7 + $0x88] sm:$0xff]  ;;  %v223_v35 = vld [vmem:[#allocation7 + $0x90] sm:$0xff]  ;;  %v394_v36 = vpack.c.bf16 %v83_v25, %v81_v24  ;;  %v396_v46 = vpack.c.bf16 %v82_v27, %v80_v26  ;;  %p533_p0 = pnand %p532_p13, %p526_p10 }
  0x3f   :  { %385 = vmatpush1.bf16.msra.mxu0 %v384_v14  ;;  %v85_v31 = vld [vmem:[#allocation5 + $0xa8] sm:$0xff]  ;;  %v410_v32 = vpack.c.bf16 %v222_v29, %v221_v28  ;;  %v205_v33 = vld [vmem:[#allocation7] sm:$0xff]  ;;  %v224_v38 = vld [vmem:[#allocation7 + $0x98] sm:$0xff] }
  0x40   :  { %387 = vmatprep.subr.bf16.mxu0 %v386_v15  ;;  %v206_v34 = vld [vmem:[#allocation7 + $0x8] sm:$0xff]  ;;  %v207_v39 = vld [vmem:[#allocation7 + $0x10] sm:$0xff]  ;;  %v208_v40 = vld [vmem:[#allocation7 + $0x18] sm:$0xff]  ;;  %v414_v42 = vpack.c.bf16 %v224_v38, %v223_v35  ;;  %v98_v35 = vlaneseq }
  0x41   :  { %v412_v37 = vpack.c.bf16 %v206_v34, %v205_v33  ;;  %v87_v41 = vld [vmem:[#allocation5 + $0xb8] sm:$0xff]  ;;  %411 = vmatprep.subr.bf16.mxu1 %v410_v32  ;;  %v225_v43 = vld [vmem:[#allocation7 + $0xa0] sm:$0xff]  ;;  %v226_v44 = vld [vmem:[#allocation7 + $0xa8] sm:$0xff]  ;;  %v416_v45 = vpack.c.bf16 %v208_v40, %v207_v39 }
  0x42   :  { %v418_v47 = vpack.c.bf16 %v226_v44, %v225_v43  ;;  %v209_v48 = vld [vmem:[#allocation7 + $0x20] sm:$0xff]  ;;  %v210_v49 = vld [vmem:[#allocation7 + $0x28] sm:$0xff]  ;;  %v398_v50 = vpack.c.bf16 %v87_v41, %v85_v31  ;;  %v86_v52 = vld [vmem:[#allocation5 + $0xb0] sm:$0xff] }
  0x43   :  { %389 = vmatpush1.bf16.msra.mxu0 %v388_v20  ;;  %413 = vmatpush3.bf16.msra.mxu1 %v412_v37  ;;  %v84_v51 = vld [vmem:[#allocation5 + $0xa0] sm:$0xff]  ;;  %v89_v53 = vld [vmem:[#allocation5 + $0xc8] sm:$0xff]  ;;  %v91_v54 = vld [vmem:[#allocation5 + $0xd8] sm:$0xff]  ;;  %v420_v55 = vpack.c.bf16 %v210_v49, %v209_v48 }
  0x44   :  { %391 = vmatprep.subr.bf16.mxu0 %v390_v21  ;;  %415 = vmatprep.subr.bf16.mxu1 %v414_v42  ;;  %v400_v56 = vpack.c.bf16 %v86_v52, %v84_v51  ;;  %v402_v57 = vpack.c.bf16 %v91_v54, %v89_v53  ;;  %v88_v58 = vld [vmem:[#allocation5 + $0xc0] sm:$0xff]  ;;  %v90_v59 = vld [vmem:[#allocation5 + $0xd0] sm:$0xff]  ;;  %v93_v60 = vld [vmem:[#allocation5 + $0xe8] sm:$0xff] }
  0x45   :  { %v95_v61 = vld [vmem:[#allocation5 + $0xf8] sm:$0xff]  ;;  %v404_v62 = vpack.c.bf16 %v90_v59, %v88_v58  ;;  %v92_v1 = vld [vmem:[#allocation5 + $0xe0] sm:$0xff]  ;;  %v94_v2 = vld [vmem:[#allocation5 + $0xf0] sm:$0xff] }
  0x46   :  { %v406_v63 = vpack.c.bf16 %v95_v61, %v93_v60  ;;  %v408_v3 = vpack.c.bf16 %v94_v2, %v92_v1  ;;  %v62_v4 = vld [vmem:[#allocation2] sm:$0xff]  ;;  %v63_v5 = vld [vmem:[#allocation2 + $0x8] sm:$0xff]  ;;  %v229_v12 = vld [vmem:[#allocation7 + $0xc0] sm:$0xff] }
  0x47   :  { %393 = vmatpush1.bf16.msra.mxu0 %v392_v30  ;;  %417 = vmatpush3.bf16.msra.mxu1 %v416_v45  ;;  %v227_v6 = vld [vmem:[#allocation7 + $0xb0] sm:$0xff]  ;;  %v228_v7 = vld [vmem:[#allocation7 + $0xb8] sm:$0xff]  ;;  %v230_v13 = vld [vmem:[#allocation7 + $0xc8] sm:$0xff] }
  0x48   :  { %395 = vmatprep.subr.bf16.mxu0 %v394_v36  ;;  %419 = vmatprep.subr.bf16.mxu1 %v418_v47  ;;  %v422_v8 = vpack.c.bf16 %v228_v7, %v227_v6  ;;  %v211_v9 = vld [vmem:[#allocation7 + $0x30] sm:$0xff]  ;;  %v212_v10 = vld [vmem:[#allocation7 + $0x38] sm:$0xff]  ;;  %v426_v14 = vpack.c.bf16 %v230_v13, %v229_v12  ;;  %v213_v15 = vld [vmem:[#allocation7 + $0x40] sm:$0xff]  ;;  %v99_v36 = vshrl.u32 %v98_v35, 7 }
  0x49   :  { %v424_v11 = vpack.c.bf16 %v212_v10, %v211_v9  ;;  %v214_v16 = vld [vmem:[#allocation7 + $0x48] sm:$0xff]  ;;  %v231_v18 = vld [vmem:[#allocation7 + $0xd0] sm:$0xff]  ;;  %v216_v21 = vld [vmem:[#allocation7 + $0x58] sm:$0xff] }
  0x4a   :  { %v428_v17 = vpack.c.bf16 %v214_v16, %v213_v15  ;;  %v215_v20 = vld [vmem:[#allocation7 + $0x50] sm:$0xff]  ;;  %v233_v23 = vld [vmem:[#allocation7 + $0xe0] sm:$0xff]  ;;  %v234_v24 = vld [vmem:[#allocation7 + $0xe8] sm:$0xff]  ;;  %v100_v37 = vsub.s32 0, %v99_v36  ;;  %v104_v39 = vsub.s32 1, %v99_v36 }
  0x4b   :  { %397 = vmatpush1.bf16.msra.mxu0 %v396_v46  ;;  %421 = vmatpush3.bf16.msra.mxu1 %v420_v55  ;;  %v432_v22 = vpack.c.bf16 %v216_v21, %v215_v20  ;;  %v434_v25 = vpack.c.bf16 %v234_v24, %v233_v23  ;;  %v217_v26 = vld [vmem:[#allocation7 + $0x60] sm:$0xff]  ;;  %v218_v27 = vld [vmem:[#allocation7 + $0x68] sm:$0xff]  ;;  %v235_v29 = vld [vmem:[#allocation7 + $0xf0] sm:$0xff] }
  0x4c   :  { %399 = vmatprep.subr.bf16.mxu0 %v398_v50  ;;  %423 = vmatprep.subr.bf16.mxu1 %v422_v8  ;;  %v436_v28 = vpack.c.bf16 %v218_v27, %v217_v26  ;;  %v236_v30 = vld [vmem:[#allocation7 + $0xf8] sm:$0xff]  ;;  %v219_v32 = vld [vmem:[#allocation7 + $0x70] sm:$0xff] }
  0x4d   :  { %v438_v31 = vpack.c.bf16 %v236_v30, %v235_v29  ;;  %v220_v33 = vld [vmem:[#allocation7 + $0x78] sm:$0xff]  ;;  %v96_v38 = vld [vmem:[%s659_s2] sm:$0x3] }
  0x4e   :  { %v440_v34 = vpack.c.bf16 %v220_v33, %v219_v32  ;;  %v101_v40 = vrot.slane %v96_v38, %v100_v37  ;;  %v105_v41 = vrot.slane %v96_v38, %v104_v39  ;;  %v339_v8 = vld [vmem:[%s661_s4] ss:$0 sm:$0xff] }
  0x4f   :  { %401 = vmatpush1.bf16.msra.mxu0 %v400_v56  ;;  %425 = vmatpush3.bf16.msra.mxu1 %v424_v11 }
  0x50   :  { %403 = vmatprep.subr.bf16.mxu0 %v402_v57  ;;  %427 = vmatprep.subr.bf16.mxu1 %v426_v14 }
  0x53   :  { %405 = vmatpush1.bf16.msra.mxu0 %v404_v62  ;;  %429 = vmatpush3.bf16.msra.mxu1 %v428_v17 }
  0x54   :  { %407 = vmatprep.subr.bf16.mxu0 %v406_v63 }
  0x57   :  { %409 = vmatpush1.bf16.msra.mxu0 %v408_v3 }
  0x5a   :  { %173 = vmatmul.mubr.f32.vlgmr.msra.gmra.mrb[0].mxu0 %v62_v4 }
  0x5b   :  { %178 = vmatprep.mubr.f32.mxu0 %v560_v0  ;;  %v232_v0 = vld [vmem:[#allocation7 + $0xd8] sm:$0xff] }
  0x5c   :  { %v430_v19 = vpack.c.bf16 %v232_v0, %v231_v18 }
  0x5e   :  { %179 = vmatmul.mubr.f32.gmra.mrb[2].mxu0 %v63_v5  ;;  %431 = vmatprep.subr.bf16.mxu1 %v430_v19 }
  0x5f   :  { %433 = vmatpush3.bf16.msra.mxu1 %v432_v22 }
  0x60   :  { %435 = vmatprep.subr.bf16.mxu1 %v434_v25 }
  0x63   :  { %437 = vmatpush3.bf16.msra.mxu1 %v436_v28 }
  0x64   :  { %439 = vmatprep.subr.bf16.mxu1 %v438_v31 }
  0x67   :  { %441 = vmatpush3.bf16.msra.mxu1 %v440_v34 }
 0x12d   :  { %v174_v42 = vpop.f32.mrb[0].mxu0 }
 0x12e   :  { %v175_v43 = vadd.f32 %v174_v42, %v101_v40  ;;  %v176_v44 = vpop.f32.mrb[1].mxu0 }
 0x12f   :  { %v177_v45 = vadd.f32 %v176_v44, %v105_v41 }
 0x130   :  { %v189_v46 = vmul.f32 0.70710677, %v175_v43  ;;  %v185_v59 = vmul.f32 0.5, %v175_v43 }
 0x131   :  { %v190_v47 = vmul.f32 0.70710677, %v177_v45  ;;  %v180_v48 = vpop.f32.mrb[2].mxu0  ;;  %v186_v57 = vmul.f32 0.5, %v177_v45 }
 0x132   :  { %451 = verf.f32 %v189_v46  ;;  %v181_v49 = vadd.f32 %v180_v48, %v101_v40  ;;  %v182_v50 = vpop.f32.mrb[3].mxu0 }
 0x133   :  { %453 = verf.f32 %v190_v47  ;;  %v183_v51 = vadd.f32 %v182_v50, %v105_v41 }
 0x134   :  { %v191_v52 = vmul.f32 0.70710677, %v181_v49  ;;  %v187_v4 = vmul.f32 0.5, %v181_v49 }
 0x135   :  { %v192_v53 = vmul.f32 0.70710677, %v183_v51  ;;  %v188_v2 = vmul.f32 0.5, %v183_v51 }
 0x136   :  { %455 = verf.f32 %v191_v52 }
 0x137   :  { %457 = verf.f32 %v192_v53 }
 0x13c   :  { %v452_v54 = vpop.eup %451 }
 0x13d   :  { %v454_v55 = vpop.eup %453  ;;  %v197_v56 = vadd.f32 1.0, %v452_v54 }
 0x13e   :  { %v198_v58 = vadd.f32 1.0, %v454_v55 }
 0x13f   :  { %v201_v1 = vmul.f32 %v197_v56, %v185_v59 }
 0x140   :  { %v456_v60 = vpop.eup %455  ;;  %v202_v61 = vmul.f32 %v198_v58, %v186_v57 }
 0x141   :  { %v458_v62 = vpop.eup %457  ;;  %v199_v63 = vadd.f32 1.0, %v456_v60 }
 0x142   :  { %v200_v3 = vadd.f32 1.0, %v458_v62  ;;  %308 = vmatprep.mubr.f32.mxu1 %v202_v61 }
 0x143   :  { %309 = vmatmul.mubr.f32.vlgmr.msra.gmra.mrb[0].mxu1 %v201_v1  ;;  %v203_v6 = vmul.f32 %v199_v63, %v187_v4 }
 0x144   :  { %v204_v5 = vmul.f32 %v200_v3, %v188_v2 }
 0x146   :  { %313 = vmatprep.mubr.f32.mxu1 %v204_v5 }
 0x147   :  { %314 = vmatmul.mubr.f32.gmra.mrb[2].mxu1 %v203_v6 }
 0x216   :  { %v372_v7 = vpop.f32.mrb[0].mxu1 }
 0x217   :  { %v373_v9 = vpop.f32.mrb[1].mxu1 }
 0x218   :  { %v374_v10 = vadd.f32 %v373_v9, %v372_v7 }
 0x21a   :  { %v311_v11 = vadd.f32 %v374_v10, %v339_v8  ;;  %v375_v12 = vpop.f32.mrb[2].mxu1 }
 0x21b   :  { %v376_v13 = vpop.f32.mrb[3].mxu1 }
 0x21c   :  { %319 = vst [vmem:[#allocation8] sm:$0xff] %v311_v11  ;;  %v377_v14 = vadd.f32 %v376_v13, %v375_v12 }
 0x21e   :  { %v316_v15 = vadd.f32 %v377_v14, %v339_v8 }
 0x220   :  { %320 = vst [vmem:[#allocation8 + $0x8] sm:$0xff] %v316_v15 }
 0x221   :  { %536 = shalt.err (!%p533_p0)
}
 0x222   :  { %s537_s12 = scalar_lea.hbm %s662_s5, 256 }
 0x223   :  { %p538_p1 = scmp.ne.s32.totalorder %s662_s5, %s537_s12  ;;  %p541_p2 = scmp.lt.u32.totalorder %s537_s12, %s662_s5 }
 0x225   :  { %p543_p3 = pnand %p541_p2, %p538_p1 }
 0x227   :  { %546 = shalt.err (!%p543_p3)
}
 0x228   :  { %332 = dma.vmem_to_hbm [thread:$0]  %s327_s9, 256, %s662_s5, [#allocation4], %s557_s1, %s557_s1, %s558_s17  }
 0x229   :  { %551 = dma.done.wait [#allocation4], 256  }
 0x22a   :  { %552 = vsyncadd [#allocation4], 4294967040 }
 0x22b   :  { %336 = vsyncpa [#allocation3], 1 }
 0x22c   :  { %337 = vsyncpa [#allocation6], 1 }
 0x22d   :  { %338 = vsyncpa [#allocation4], 1 }

</bundles_post_ra>
